<compile_context>
chip_gen: v5e
topology: v5e:2x2
jax: 0.10.0
libtpu: 0.0.40
codegen_flags: <defaults>
</compile_context>

<pallas_src>
import functools

import jax
import jax.numpy as jnp
from jax import lax
from jax.experimental import pallas as pl
from jax.experimental.pallas import tpu as pltpu


def _hashnet_kernel(u_ref, y_ref, w_ref, out_ref, lp_acc, tot_acc, s1_acc,
                    *, alpha, bit):
    """Processes one lane-dense (bit+C, tile) slab of the fused bank.

    Grid = (num_par, steps): axis 0 is an independent ("parallel") chunk of
    the bank, axis 1 ("arbitrary") streams tiles of that chunk and accumulates
    (B, tile) partial sums in VMEM scratch.
    """
    k = pl.program_id(1)

    @pl.when(k == 0)
    def _():
        lp_acc[...] = jnp.zeros_like(lp_acc)
        tot_acc[...] = jnp.zeros_like(tot_acc)
        s1_acc[...] = jnp.zeros_like(s1_acc)

    u_bank = w_ref[:bit, :]   # (bit, tile) static view of the fused bank tile
    y_bank = w_ref[bit:, :]   # (C,   tile)

    contract = (((1,), (0,)), ((), ()))   # plain lhs @ rhs

    # similarity tile = (y @ Y_tile > 0), exactly 0/1        -> (B, tile) f32
    sim = (lax.dot_general(y_ref[...], y_bank, contract,
                           preferred_element_type=jnp.float32)
           > 0).astype(jnp.float32)

    # dot_product tile = alpha * u @ U_tile                  -> (B, tile) f32
    dp = alpha * lax.dot_general(u_ref[...], u_bank, contract,
                                 preferred_element_type=jnp.float32)

    # exp_loss = log(1 + exp(-|dp|)) + clamp(dp, 0) - sim * dp
    exp_loss = (jnp.log(1.0 + jnp.exp(-jnp.abs(dp)))
                + jnp.maximum(dp, 0.0)
                - sim * dp)

    # Vector partial sums only (no per-step cross-lane reductions).
    lp_acc[...] += exp_loss * sim    # positive-pair loss
    tot_acc[...] += exp_loss         # total loss
    s1_acc[...] += sim               # number of positive pairs

    @pl.when(k == pl.num_programs(1) - 1)
    def _():
        lp = jnp.sum(lp_acc[...])
        tot = jnp.sum(tot_acc[...])
        s1 = jnp.sum(s1_acc[...])
        # Pack the three scalars into lanes 0/1/2 of a full (1,1,128) vreg so
        # the single output store is an unmasked full-width vst.
        lane = lax.broadcasted_iota(jnp.int32, out_ref.shape, 2)
        out_ref[...] = (jnp.where(lane == 0, lp, 0.0)
                        + jnp.where(lane == 1, tot, 0.0)
                        + jnp.where(lane == 2, s1, 0.0))


def init_bank(U, Y, dtype=jnp.bfloat16):
    """Fuse + transpose the persistent banks into the kernel layout (bit+C, N)."""
    return jnp.concatenate([U.T, Y.T], axis=0).astype(dtype)


def hashnet_loss(u, y, ind, bank, *, scale=1.0, alpha=0.1,
                 tile_n=16384, num_par=1):
    """HashNetLoss.forward.  Returns (loss, bank_new).

    `bank` is the fused transposed persistent state (bit + num_classes, N)
    produced by init_bank; rows [0:bit] hold tanh(U).T, rows [bit:] hold Y.T.
    It is carried permanently in its (narrow) dtype and should be donated
    (jax.jit(..., donate_argnums)) so the per-call scatter update is in-place.
    num_par=2 is only useful on v7x (two TensorCores); use 1 on v5e/v6e.
    """
    B, bit = u.shape
    C = y.shape[1]
    F, N = bank.shape
    assert F == bit + C, (F, bit, C)

    # --- glue: tanh + in-place memory-bank update (before the matmuls) ---
    u_t = jnp.tanh(scale * u.astype(jnp.float32))
    y_f = y.astype(jnp.float32)
    new_cols = jnp.concatenate([u_t.T, y_f.T], axis=0).astype(bank.dtype)
    bank_new = bank.at[:, ind].set(new_cols)     # B-column scatter, tiny
    u_in = u_t.astype(bank.dtype)
    y_in = y_f.astype(bank.dtype)

    # --- tiling: num_par independent chunks, each streamed in `steps` tiles ---
    if N % num_par != 0:
        num_par = 1
    chunk = N // num_par
    # TODO(synk): arbitrary N needs a padded/masked tail tile; demo shapes are
    # multiples of 128 so the largest 128-multiple divisor of `chunk` is used.
    assert chunk % 128 == 0, ("bank rows per chunk must be a multiple of 128",
                              N, num_par)
    tile = max(128, (min(tile_n, chunk) // 128) * 128)
    while chunk % tile != 0:
        tile -= 128
    steps = chunk // tile

    kernel = functools.partial(_hashnet_kernel, alpha=float(alpha), bit=bit)
    partials = pl.pallas_call(
        kernel,
        out_shape=jax.ShapeDtypeStruct((num_par, 1, 128), jnp.float32),
        grid_spec=pltpu.PrefetchScalarGridSpec(
            num_scalar_prefetch=0,
            grid=(num_par, steps),
            in_specs=[
                pl.BlockSpec((B, bit), lambda p, k: (0, 0)),   # tanh(u)
                pl.BlockSpec((B, C), lambda p, k: (0, 0)),     # y
                pl.BlockSpec((bit + C, tile),                  # fused bank tile
                             lambda p, k: (0, p * steps + k)),
            ],
            out_specs=pl.BlockSpec((1, 1, 128), lambda p, k: (p, 0, 0)),
            scratch_shapes=[pltpu.VMEM((B, tile), jnp.float32),   # lp partials
                            pltpu.VMEM((B, tile), jnp.float32),   # total
                            pltpu.VMEM((B, tile), jnp.float32)],  # s1
        ),
        compiler_params=pltpu.CompilerParams(
            dimension_semantics=("parallel", "arbitrary"),
            vmem_limit_bytes=32 * 1024 * 1024),
    )(u_in, y_in, bank_new)

    # --- tiny epilogue combine (plain JAX) ---
    lp = jnp.sum(partials[:, 0, 0])            # positive-pair loss sum
    tot = jnp.sum(partials[:, 0, 1])           # total loss sum
    S1 = jnp.sum(partials[:, 0, 2])            # #positive pairs
    S = jnp.float32(B * N)                     # every pair is pos or neg
    S0 = S - S1
    ln = tot - lp
    # Guarded division (PyTorch would yield NaN/Inf if a mask were empty).
    safe_S1 = jnp.where(S1 > 0, S1, 1.0)
    safe_S0 = jnp.where(S0 > 0, S0, 1.0)
    loss = (lp * (S / safe_S1) + ln * (S / safe_S0)) / S
    return loss, bank_new


def hashnet_loss_ref(u, y, ind, U, Y, *, scale=1.0, alpha=0.1):
    """Pure-JAX (f32) reference mirroring the PyTorch forward."""
    u_t = jnp.tanh(scale * u)
    y_f = y.astype(jnp.float32)
    U = U.astype(jnp.float32).at[ind, :].set(u_t)
    Y = Y.astype(jnp.float32).at[ind, :].set(y_f)
    sim = (y_f @ Y.T > 0).astype(jnp.float32)
    dp = alpha * (u_t @ U.T)
    exp_loss = (jnp.log(1.0 + jnp.exp(-jnp.abs(dp)))
                + jnp.maximum(dp, 0.0) - sim * dp)
    pos = sim > 0
    S1 = jnp.sum(pos.astype(jnp.float32))
    S0 = jnp.sum((~pos).astype(jnp.float32))
    S = S0 + S1
    exp_loss = jnp.where(pos, exp_loss * (S / S1), exp_loss * (S / S0))
    return jnp.sum(exp_loss) / S


if __name__ == "__main__":
    # Small deterministic shapes: batch=8, bit=32, num_classes=16, num_train=2048.
    B, BIT, C, N = 8, 32, 16, 2048

    key = jax.random.PRNGKey(0)
    k_u, k_y, k_ind, k_U, k_Y = jax.random.split(key, 5)

    u = jax.random.normal(k_u, (B, BIT), dtype=jnp.float32)
    y = jax.nn.one_hot(jax.random.randint(k_y, (B,), 0, C), C,
                       dtype=jnp.float32)
    ind = jax.random.permutation(k_ind, N)[:B]          # unique indices

    # Emulate a mid-training memory bank so both mask branches are exercised.
    U_state = jnp.tanh(jax.random.normal(k_U, (N, BIT), dtype=jnp.float32))
    Y_state = jax.nn.one_hot(jax.random.randint(k_Y, (N,), 0, C), C,
                             dtype=jnp.float32)

    loss_ref = hashnet_loss_ref(u, y, ind, U_state, Y_state,
                                scale=1.0, alpha=0.1)
    U_ref = U_state.at[ind, :].set(jnp.tanh(u))
    Y_ref = Y_state.at[ind, :].set(y)

    # 1) f32 bank, small tiles + 2 parallel chunks: exercises multi-step
    #    accumulation and the parallel axis.  Bank is donated (in-place scatter).
    step32 = jax.jit(functools.partial(hashnet_loss, scale=1.0, alpha=0.1,
                                       tile_n=256, num_par=2),
                     donate_argnums=(3,))
    bank32 = init_bank(U_state, Y_state, jnp.float32)
    loss32, bank32_new = step32(u, y, ind, bank32)
    loss32 = jax.block_until_ready(loss32)
    assert jnp.allclose(loss32, loss_ref, rtol=1e-4, atol=1e-5), (loss32, loss_ref)
    assert jnp.allclose(bank32_new[:BIT, :].T, U_ref, rtol=1e-6, atol=1e-6)
    assert jnp.allclose(bank32_new[BIT:, :].T, Y_ref, rtol=0.0, atol=1e-6)

    # 2) bf16 bank (recommended config), default large tiles, single chunk.
    step16 = jax.jit(functools.partial(hashnet_loss, scale=1.0, alpha=0.1),
                     donate_argnums=(3,))
    bank16 = init_bank(U_state, Y_state, jnp.bfloat16)
    loss16, bank16_new = step16(u, y, ind, bank16)
    loss16 = jax.block_until_ready(loss16)
    assert jnp.allclose(loss16, loss_ref, rtol=5e-3, atol=1e-4), (loss16, loss_ref)

    print("KERNEL_OK")
</pallas_src>

<mosaic_0001>
module attributes {stable_mosaic.version = 11 : i64} {
  func.func @_hashnet_kernel(%arg0: i32, %arg1: i32, %arg2: memref<8x32xf32, #tpu.memory_space<vmem>>, %arg3: memref<8x16xf32, #tpu.memory_space<vmem>>, %arg4: memref<48x256xf32, #tpu.memory_space<vmem>>, %arg5: memref<1x1x128xf32, #tpu.memory_space<vmem>>, %arg6: memref<8x256xf32, #tpu.memory_space<vmem>>, %arg7: memref<8x256xf32, #tpu.memory_space<vmem>>, %arg8: memref<8x256xf32, #tpu.memory_space<vmem>>) attributes {dimension_semantics = [#tpu.dimension_semantics<parallel>, #tpu.dimension_semantics<arbitrary>], iteration_bounds = array<i64: 2, 4>, scalar_prefetch = 0 : i64, scratch_operands = 3 : i64, tpu.core_type = #tpu.core_type<tc>, window_params = [{pipeline_mode = #tpu.pipeline_mode<synchronous>, transform_indices = @transform_0, window_bounds = array<i64: 8, 32>}, {pipeline_mode = #tpu.pipeline_mode<synchronous>, transform_indices = @transform_1, window_bounds = array<i64: 8, 16>}, {transform_indices = @transform_2, window_bounds = array<i64: 48, 256>}, {transform_indices = @transform_3, window_bounds = array<i64: 1, 1, 128>}]} {
    %c0_i32 = arith.constant 0 : i32
    %0 = arith.cmpi eq, %arg1, %c0_i32 : i32
    %1 = arith.extui %0 : i1 to i32
    %c0_i32_0 = arith.constant 0 : i32
    %2 = arith.cmpi ne, %1, %c0_i32_0 : i32
    scf.if %2 {
      %cst_26 = arith.constant 0.000000e+00 : f32
      %40 = vector.broadcast %cst_26 : f32 to vector<8x256xf32>
      %c0_27 = arith.constant 0 : index
      %c0_28 = arith.constant 0 : index
      %41 = vector.load %arg6[%c0_27, %c0_28] : memref<8x256xf32, #tpu.memory_space<vmem>>, vector<8x256xf32>
      tpu.vector_store %arg6[%c0_27, %c0_28], %40 {strides = array<i32>} : memref<8x256xf32, #tpu.memory_space<vmem>>, vector<8x256xf32>,
      %cst_29 = arith.constant 0.000000e+00 : f32
      %42 = vector.broadcast %cst_29 : f32 to vector<8x256xf32>
      %c0_30 = arith.constant 0 : index
      %c0_31 = arith.constant 0 : index
      %43 = vector.load %arg7[%c0_30, %c0_31] : memref<8x256xf32, #tpu.memory_space<vmem>>, vector<8x256xf32>
      tpu.vector_store %arg7[%c0_30, %c0_31], %42 {strides = array<i32>} : memref<8x256xf32, #tpu.memory_space<vmem>>, vector<8x256xf32>,
      %cst_32 = arith.constant 0.000000e+00 : f32
      %44 = vector.broadcast %cst_32 : f32 to vector<8x256xf32>
      %c0_33 = arith.constant 0 : index
      %c0_34 = arith.constant 0 : index
      %45 = vector.load %arg8[%c0_33, %c0_34] : memref<8x256xf32, #tpu.memory_space<vmem>>, vector<8x256xf32>
      tpu.vector_store %arg8[%c0_33, %c0_34], %44 {strides = array<i32>} : memref<8x256xf32, #tpu.memory_space<vmem>>, vector<8x256xf32>,
    } else {
    }
    %c0 = arith.constant 0 : index
    %c0_1 = arith.constant 0 : index
    %3 = vector.load %arg4[%c0, %c0_1] : memref<48x256xf32, #tpu.memory_space<vmem>>, vector<32x256xf32>
    %c32 = arith.constant 32 : index
    %c0_2 = arith.constant 0 : index
    %4 = vector.load %arg4[%c32, %c0_2] : memref<48x256xf32, #tpu.memory_space<vmem>>, vector<16x256xf32>
    %c0_3 = arith.constant 0 : index
    %c0_4 = arith.constant 0 : index
    %5 = vector.load %arg3[%c0_3, %c0_4] : memref<8x16xf32, #tpu.memory_space<vmem>>, vector<8x16xf32>
    %cst = arith.constant dense<0.000000e+00> : vector<8x256xf32>
    %6 = tpu.matmul %5, %4, %cst {dimension_numbers = #tpu.dot_dimension_numbers<[1], [0], [0], [1], [0, 0, 1, 1], [], []>} : vector<8x16xf32>, vector<16x256xf32>, vector<8x256xf32> -> vector<8x256xf32>
    %cst_5 = arith.constant 0.000000e+00 : f32
    %7 = vector.broadcast %cst_5 : f32 to vector<8x256xf32>
    %8 = arith.cmpf ogt, %6, %7 : vector<8x256xf32>
    %9 = arith.extui %8 : vector<8x256xi1> to vector<8x256xi32>
    %10 = arith.sitofp %9 : vector<8x256xi32> to vector<8x256xf32>
    %c0_6 = arith.constant 0 : index
    %c0_7 = arith.constant 0 : index
    %11 = vector.load %arg2[%c0_6, %c0_7] : memref<8x32xf32, #tpu.memory_space<vmem>>, vector<8x32xf32>
    %cst_8 = arith.constant dense<0.000000e+00> : vector<8x256xf32>
    %12 = tpu.matmul %11, %3, %cst_8 {dimension_numbers = #tpu.dot_dimension_numbers<[1], [0], [0], [1], [0, 0, 1, 1], [], []>} : vector<8x32xf32>, vector<32x256xf32>, vector<8x256xf32> -> vector<8x256xf32>
    %cst_9 = arith.constant 1.000000e-01 : f32
    %13 = vector.broadcast %cst_9 : f32 to vector<8x256xf32>
    %14 = arith.mulf %13, %12 : vector<8x256xf32>
    %15 = math.absf %14 : vector<8x256xf32>
    %cst_10 = arith.constant 0.000000e+00 : f32
    %16 = vector.broadcast %cst_10 : f32 to vector<8x256xf32>
    %17 = arith.subf %16, %15 : vector<8x256xf32>
    %18 = math.exp %17 : vector<8x256xf32>
    %cst_11 = arith.constant 1.000000e+00 : f32
    %19 = vector.broadcast %cst_11 : f32 to vector<8x256xf32>
    %20 = arith.addf %19, %18 : vector<8x256xf32>
    %21 = math.log %20 : vector<8x256xf32>
    %cst_12 = arith.constant 0.000000e+00 : f32
    %22 = vector.broadcast %cst_12 : f32 to vector<8x256xf32>
    %23 = arith.maximumf %14, %22 : vector<8x256xf32>
    %24 = arith.addf %21, %23 : vector<8x256xf32>
    %25 = arith.mulf %10, %14 : vector<8x256xf32>
    %26 = arith.subf %24, %25 : vector<8x256xf32>
    %c0_13 = arith.constant 0 : index
    %c0_14 = arith.constant 0 : index
    %27 = vector.load %arg6[%c0_13, %c0_14] : memref<8x256xf32, #tpu.memory_space<vmem>>, vector<8x256xf32>
    %28 = arith.mulf %26, %10 : vector<8x256xf32>
    %29 = arith.addf %27, %28 : vector<8x256xf32>
    %c0_15 = arith.constant 0 : index
    %c0_16 = arith.constant 0 : index
    %30 = vector.load %arg6[%c0_15, %c0_16] : memref<8x256xf32, #tpu.memory_space<vmem>>, vector<8x256xf32>
    tpu.vector_store %arg6[%c0_15, %c0_16], %29 {strides = array<i32>} : memref<8x256xf32, #tpu.memory_space<vmem>>, vector<8x256xf32>,
    %c0_17 = arith.constant 0 : index
    %c0_18 = arith.constant 0 : index
    %31 = vector.load %arg7[%c0_17, %c0_18] : memref<8x256xf32, #tpu.memory_space<vmem>>, vector<8x256xf32>
    %32 = arith.addf %31, %26 : vector<8x256xf32>
    %c0_19 = arith.constant 0 : index
    %c0_20 = arith.constant 0 : index
    %33 = vector.load %arg7[%c0_19, %c0_20] : memref<8x256xf32, #tpu.memory_space<vmem>>, vector<8x256xf32>
    tpu.vector_store %arg7[%c0_19, %c0_20], %32 {strides = array<i32>} : memref<8x256xf32, #tpu.memory_space<vmem>>, vector<8x256xf32>,
    %c0_21 = arith.constant 0 : index
    %c0_22 = arith.constant 0 : index
    %34 = vector.load %arg8[%c0_21, %c0_22] : memref<8x256xf32, #tpu.memory_space<vmem>>, vector<8x256xf32>
    %35 = arith.addf %34, %10 : vector<8x256xf32>
    %c0_23 = arith.constant 0 : index
    %c0_24 = arith.constant 0 : index
    %36 = vector.load %arg8[%c0_23, %c0_24] : memref<8x256xf32, #tpu.memory_space<vmem>>, vector<8x256xf32>
    tpu.vector_store %arg8[%c0_23, %c0_24], %35 {strides = array<i32>} : memref<8x256xf32, #tpu.memory_space<vmem>>, vector<8x256xf32>,
    %c3_i32 = arith.constant 3 : i32
    %37 = arith.cmpi eq, %arg1, %c3_i32 : i32
    %38 = arith.extui %37 : i1 to i32
    %c0_i32_25 = arith.constant 0 : i32
    %39 = arith.cmpi ne, %38, %c0_i32_25 : i32
    scf.if %39 {
      %c0_26 = arith.constant 0 : index
      %c0_27 = arith.constant 0 : index
      %40 = vector.load %arg6[%c0_26, %c0_27] : memref<8x256xf32, #tpu.memory_space<vmem>>, vector<8x256xf32>
      %41 = vector.shape_cast %40 : vector<8x256xf32> to vector<1x8x256xf32>
      %cst_28 = arith.constant dense<0.000000e+00> : vector<1xf32>
      %42 = vector.multi_reduction <add>, %41, %cst_28 [1, 2] : vector<1x8x256xf32> to vector<1xf32>
      %43 = vector.shape_cast %42 : vector<1xf32> to vector<1x1x1xf32>
      %44 = vector.extract %43[0, 0, 0] : f32 from vector<1x1x1xf32>
      %c0_29 = arith.constant 0 : index
      %c0_30 = arith.constant 0 : index
      %45 = vector.load %arg7[%c0_29, %c0_30] : memref<8x256xf32, #tpu.memory_space<vmem>>, vector<8x256xf32>
      %46 = vector.shape_cast %45 : vector<8x256xf32> to vector<1x8x256xf32>
      %cst_31 = arith.constant dense<0.000000e+00> : vector<1xf32>
      %47 = vector.multi_reduction <add>, %46, %cst_31 [1, 2] : vector<1x8x256xf32> to vector<1xf32>
      %48 = vector.shape_cast %47 : vector<1xf32> to vector<1x1x1xf32>
      %49 = vector.extract %48[0, 0, 0] : f32 from vector<1x1x1xf32>
      %c0_32 = arith.constant 0 : index
      %c0_33 = arith.constant 0 : index
      %50 = vector.load %arg8[%c0_32, %c0_33] : memref<8x256xf32, #tpu.memory_space<vmem>>, vector<8x256xf32>
      %51 = vector.shape_cast %50 : vector<8x256xf32> to vector<1x8x256xf32>
      %cst_34 = arith.constant dense<0.000000e+00> : vector<1xf32>
      %52 = vector.multi_reduction <add>, %51, %cst_34 [1, 2] : vector<1x8x256xf32> to vector<1xf32>
      %53 = vector.shape_cast %52 : vector<1xf32> to vector<1x1x1xf32>
      %54 = vector.extract %53[0, 0, 0] : f32 from vector<1x1x1xf32>
      %55 = tpu.iota {dimensions = array<i32: 2>} : vector<1x1x128xi32>
      %c0_i32_35 = arith.constant 0 : i32
      %56 = vector.broadcast %c0_i32_35 : i32 to vector<1x1x128xi32>
      %57 = arith.cmpi eq, %55, %56 : vector<1x1x128xi32>
      %cst_36 = arith.constant 0.000000e+00 : f32
      %58 = vector.broadcast %44 : f32 to vector<1x1x128xf32>
      %59 = vector.broadcast %cst_36 : f32 to vector<1x1x128xf32>
      %60 = arith.select %57, %58, %59 : vector<1x1x128xi1>, vector<1x1x128xf32>
      %c1_i32 = arith.constant 1 : i32
      %61 = vector.broadcast %c1_i32 : i32 to vector<1x1x128xi32>
      %62 = arith.cmpi eq, %55, %61 : vector<1x1x128xi32>
      %cst_37 = arith.constant 0.000000e+00 : f32
      %63 = vector.broadcast %49 : f32 to vector<1x1x128xf32>
      %64 = vector.broadcast %cst_37 : f32 to vector<1x1x128xf32>
      %65 = arith.select %62, %63, %64 : vector<1x1x128xi1>, vector<1x1x128xf32>
      %66 = arith.addf %60, %65 : vector<1x1x128xf32>
      %c2_i32 = arith.constant 2 : i32
      %67 = vector.broadcast %c2_i32 : i32 to vector<1x1x128xi32>
      %68 = arith.cmpi eq, %55, %67 : vector<1x1x128xi32>
      %cst_38 = arith.constant 0.000000e+00 : f32
      %69 = vector.broadcast %54 : f32 to vector<1x1x128xf32>
      %70 = vector.broadcast %cst_38 : f32 to vector<1x1x128xf32>
      %71 = arith.select %68, %69, %70 : vector<1x1x128xi1>, vector<1x1x128xf32>
      %72 = arith.addf %66, %71 : vector<1x1x128xf32>
      %c0_39 = arith.constant 0 : index
      %c0_40 = arith.constant 0 : index
      %c0_41 = arith.constant 0 : index
      %73 = vector.load %arg5[%c0_39, %c0_40, %c0_41] : memref<1x1x128xf32, #tpu.memory_space<vmem>>, vector<1x1x128xf32>
      tpu.vector_store %arg5[%c0_39, %c0_40, %c0_41], %72 {strides = array<i32>} : memref<1x1x128xf32, #tpu.memory_space<vmem>>, vector<1x1x128xf32>,
    } else {
    }
    return
  }
  func.func @transform_0(%arg0: i32, %arg1: i32) -> (i32, i32) {
    %c0_i32 = arith.constant 0 : i32
    %c0_i32_0 = arith.constant 0 : i32
    %c0_i32_1 = arith.constant 0 : i32
    return %c0_i32, %c0_i32_0 : i32, i32
  }
  func.func @transform_1(%arg0: i32, %arg1: i32) -> (i32, i32) {
    %c0_i32 = arith.constant 0 : i32
    %c0_i32_0 = arith.constant 0 : i32
    %c0_i32_1 = arith.constant 0 : i32
    return %c0_i32, %c0_i32_0 : i32, i32
  }
  func.func @transform_2(%arg0: i32, %arg1: i32) -> (i32, i32) {
    %c4_i32 = arith.constant 4 : i32
    %0 = arith.muli %arg0, %c4_i32 : i32
    %1 = arith.addi %0, %arg1 : i32
    %c0_i32 = arith.constant 0 : i32
    %c0_i32_0 = arith.constant 0 : i32
    return %c0_i32, %1 : i32, i32
  }
  func.func @transform_3(%arg0: i32, %arg1: i32) -> (i32, i32, i32) {
    %c0_i32 = arith.constant 0 : i32
    %c0_i32_0 = arith.constant 0 : i32
    %c0_i32_1 = arith.constant 0 : i32
    return %arg0, %c0_i32, %c0_i32_0 : i32, i32, i32
  }
}

</mosaic_0001>

<bundles_post_ra>
// kernel: hashnet_loss.1
= control target key start
LH: loop header
LB: loop body
LE: loop exit
PB: predicated region body
PF: predicated region fallthrough
CT: control target
= control target key end

     0   :  { %s685_s12 = smov 0   ;;  %s687_s13 = smov 0   ;;  %s788_s0 = inlined_call_operand.vmem [shape: f32[8,32], index: 0, kind: input, shape index: {}]   ;;  %s789_s1 = inlined_call_operand.vmem [shape: f32[8,16], index: 1, kind: input, shape index: {}]   ;;  %s790_s2 = inlined_call_operand.vmem [shape: f32[48,2048], index: 2, kind: input, shape index: {}]   ;;  %s791_s3 = inlined_call_operand.vmem [shape: f32[2,1,128], index: 3, kind: output, shape index: {}]  }
   0x1   :  { %s689_s14 = smov 0   ;;  %s691_s15 = smov 0  }
   0x2   :  { %s693_s16 = smov 0   ;;  %s695_s17 = smov 0  }
   0x3   :  { %s697_s18 = smov 0  }
   0x4 LB: > { %s22_s19 = sadd.s32 1, %s653_s16  ;;  %s25_s20 = sadd.s32 1, %s657_s17  ;;  %s661_s18 = sphi %s697_s18, %s13_s18   ;;  %s657_s17 = sphi %s695_s17, %s797_s17   ;;  %s653_s16 = sphi %s693_s16, %s796_s16   ;;  %s649_s15 = sphi %s691_s15, %s795_s15   ;;  %s645_s14 = sphi %s689_s14, %s794_s14   ;;  %s641_s13 = sphi %s687_s13, %s793_s13   ;;  %s637_s12 = sphi %s685_s12, %s792_s12  }
   0x5   : > { %p23_p0 = scmp.ge.s32.totalorder %s22_s19, 4  ;;  %p85_p1 = scmp.ne.s32.totalorder %s641_s13, %s637_s12 }
   0x6   : > { %p86_p2 = scmp.eq.s32.totalorder %s661_s18, 0  ;;  %s514_s21 = sshll.u32 %s657_s17, 2 }
   0x7   : > { %s799_s19 = smov (%p23_p0, %s22_s19), 0  ;;  %s801_s20 = smov (!%p23_p0, %s25_s20), %s657_s17 }
   0x8   : > { %p27_p3 = scmp.ge.s32.totalorder %s801_s20, 2  ;;  %p87_p4 = por %p86_p2, %p85_p1 }
   0x9   : > { %s72_s22 = sadd.s32 %s653_s16, %s514_s21  ;;  %s78_s26 = sadd.s32 1, %s641_s13 }
   0xa   : > { %s803_s20 = smov (%p27_p3, %s801_s20), 0  ;;  %p517_p6 = scmp.ge.s32.totalorder %s661_s18, 8 }
   0xb   : > { %s515_s23 = sshll.u32 %s803_s20, 2 }
   0xc   : > { %s74_s24 = sadd.s32 %s515_s23, %s799_s19  ;;  %143 = sbr.rel (%p517_p6) target bundleno = 33 (0x21), region = 24 }
   0xd   : > { %s75_s25 = ssub.s32 %s72_s22, %s74_s24 }
   0xe   : > { %p76_p5 = scmp.eq.s32.totalorder %s75_s25, 0 }
  0x10   : > { %s736_s27 = scalar_select %p76_p5, %s641_s13, %s78_s26  }
  0x11   : > { %146 = sbr.rel (!%p87_p4) target bundleno = 33 (0x21), region = 28  ;;  %s148_s28 = sand.u32 (%p87_p4), 1, %s641_s13  }
  0x12   : > { %s532_s29 = sshll.u32 (%p87_p4), %s72_s22, 4  ;;  %s533_s30 = smul.u32 (%p87_p4), 96, %s148_s28 }
  0x13   : > { %s155_s6 = scalar_lea.vmem (%p87_p4), %s790_s2, %s532_s29 }
  0x14   : > { %v168_v0 = vld [vmem:[%s155_s6] sm:$0xff] (%p87_p4)  ;;  %v170_v1 = vld [vmem:[%s155_s6 + $0x8] sm:$0xff] (%p87_p4)  ;;  %s150_s7 = scalar_lea.vmem (%p87_p4), [#allocation5], %s533_s30 }
  0x15   : > { %v172_v2 = vld [vmem:[%s155_s6 + $0x80] sm:$0xff] (%p87_p4)  ;;  %169 = vst [vmem:[%s150_s7] sm:$0xff] (%p87_p4), %v168_v0  ;;  %v174_v3 = vld [vmem:[%s155_s6 + $0x88] sm:$0xff] (%p87_p4) }
  0x16   : > { %171 = vst [vmem:[%s150_s7 + $0x8] sm:$0xff] %v170_v1  ;;  %v176_v4 = vld [vmem:[%s155_s6 + $0x100] sm:$0xff]  ;;  %v178_v5 = vld [vmem:[%s155_s6 + $0x108] sm:$0xff] }
  0x17   : > { %173 = vst [vmem:[%s150_s7 + $0x10] sm:$0xff] %v172_v2  ;;  %v180_v6 = vld [vmem:[%s155_s6 + $0x180] sm:$0xff]  ;;  %v182_v7 = vld [vmem:[%s155_s6 + $0x188] sm:$0xff] }
  0x18   : > { %175 = vst [vmem:[%s150_s7 + $0x18] sm:$0xff] %v174_v3  ;;  %v184_v8 = vld [vmem:[%s155_s6 + $0x200] sm:$0xff]  ;;  %v186_v9 = vld [vmem:[%s155_s6 + $0x208] sm:$0xff] }
  0x19   : > { %177 = vst [vmem:[%s150_s7 + $0x20] sm:$0xff] %v176_v4  ;;  %v188_v10 = vld [vmem:[%s155_s6 + $0x280] sm:$0xff]  ;;  %v190_v11 = vld [vmem:[%s155_s6 + $0x288] sm:$0xff] }
  0x1a   : > { %179 = vst [vmem:[%s150_s7 + $0x28] sm:$0xff] %v178_v5 }
  0x1b   : > { %181 = vst [vmem:[%s150_s7 + $0x30] sm:$0xff] %v180_v6 }
  0x1c   : > { %183 = vst [vmem:[%s150_s7 + $0x38] sm:$0xff] %v182_v7 }
  0x1d   : > { %185 = vst [vmem:[%s150_s7 + $0x40] sm:$0xff] %v184_v8 }
  0x1e   : > { %187 = vst [vmem:[%s150_s7 + $0x48] sm:$0xff] %v186_v9 }
  0x1f   : > { %189 = vst [vmem:[%s150_s7 + $0x50] sm:$0xff] %v188_v10 }
  0x20   : > { %191 = vst [vmem:[%s150_s7 + $0x58] sm:$0xff] %v190_v11 }
  0x21 PF: > { %p521_p7 = scmp.ge.s32.totalorder %s661_s18, 1  ;;  %p196_p8 = scmp.lt.s32.totalorder %s661_s18, 9 }
  0x23   : > { %p197_p9 = pnand %p521_p7, %p196_p8 }
  0x24   : > { %s203_s8 = sand.u32 (!%p197_p9), 1, %s637_s12   ;;  %p227_p10 = scmp.lt.s32.totalorder (!%p197_p9), %s649_s15, 1 }
  0x25   : > { %200 = sbr.rel (%p197_p9) target bundleno = 432 (0x1b0), region = 51  ;;  %p522_p11 = scmp.ne.s32.totalorder (!%p197_p9), %s645_s14, 0 }
  0x26   : > { %s534_s9 = smul.u32 (!%p197_p9), 96, %s203_s8 }
  0x28   : > { %s205_s22 = scalar_lea.vmem (!%p197_p9), [#allocation5], %s534_s9 }
  0x2a   : > { %s805_s15 = smov (!%p227_p10, %s649_s15), 1  ;;  %233 = sbr.rel (%p522_p11) target bundleno = 54 (0x36), region = 59 }
  0x2b   : > { %s229_s21 = scalar_lea.vmem %s791_s3, %s805_s15 }
  0x2f   : > { %v663_v12 = vmov 0.0  }
  0x30   : > { %234 = vst [vmem:[#allocation2] sm:$0xff] %v663_v12 }
  0x31   : > { %235 = vst [vmem:[#allocation2 + $0x8] sm:$0xff] %v663_v12 }
  0x32   : > { %236 = vst [vmem:[#allocation3 + $0x8] sm:$0xff] %v663_v12 }
  0x33   : > { %237 = vst [vmem:[#allocation3] sm:$0xff] %v663_v12 }
  0x34   : > { %238 = vst [vmem:[#allocation4 + $0x8] sm:$0xff] %v663_v12 }
  0x35   : > { %239 = vst [vmem:[#allocation4] sm:$0xff] %v663_v12 }
  0x36 PF: > { %v246_v13 = vld [vmem:[%s205_s22 + $0x30] sm:$0xff]  ;;  %v247_v14 = vld [vmem:[%s205_s22 + $0x38] sm:$0xff]  ;;  %v244_v15 = vld [vmem:[%s205_s22 + $0x20] sm:$0xff]  ;;  %vm304_vm0 = vcmask 261120   ;;  %vm253_vm1 = vcmask 130048   ;;  %v664_v31 = vmov 0.0  }
  0x37   : > { %320 = vmatpush.msra.mxu2 %v246_v13  ;;  %340 = vmatpush.msra.mxu3 %v247_v14  ;;  %v245_v16 = vld [vmem:[%s205_s22 + $0x28] sm:$0xff]  ;;  %v242_v17 = vld [vmem:[%s205_s22 + $0x10] sm:$0xff]  ;;  %v243_v18 = vld [vmem:[%s205_s22 + $0x18] sm:$0xff]  ;;  %p529_p12 = scmp.ne.s32.totalorder %s645_s14, 3 }
  0x38   : > { %v250_v19 = vld [vmem:[%s205_s22 + $0x50] sm:$0xff]  ;;  %v251_v20 = vld [vmem:[%s205_s22 + $0x58] sm:$0xff]  ;;  %v248_v21 = vld [vmem:[%s205_s22 + $0x40] sm:$0xff] }
  0x39   : > { %321 = vmatpush.msra.mxu2 %v244_v15  ;;  %341 = vmatpush.msra.mxu3 %v245_v16  ;;  %v240_v22 = vld [vmem:[%s205_s22] sm:$0xff]  ;;  %v241_v23 = vld [vmem:[%s205_s22 + $0x8] sm:$0xff]  ;;  %v303_v25 = vld [vmem:[%s788_s0] sm:$0xff] }
  0x3a   : > { %271 = vmatpush.msra.mxu0 %v250_v19  ;;  %291 = vmatpush.msra.mxu1 %v251_v20  ;;  %v249_v24 = vld [vmem:[%s205_s22 + $0x48] sm:$0xff]  ;;  %v252_v26 = vld [vmem:[%s789_s1] sm:$0xff]  ;;  %v381_v62 = vld [vmem:[#allocation3] sm:$0xff] }
  0x3b   : > { %322 = vmatpush.msra.mxu2 %v242_v17  ;;  %342 = vmatpush.msra.mxu3 %v243_v18  ;;  %v386_v28 = vld [vmem:[#allocation4 + $0x8] sm:$0xff]  ;;  %v380_v58 = vld [vmem:[#allocation3 + $0x8] sm:$0xff]  ;;  %v372_v63 = vld [vmem:[#allocation2] sm:$0xff] }
  0x3c   : > { %272 = vmatpush.msra.mxu0 %v248_v21  ;;  %292 = vmatpush.msra.mxu1 %v249_v24  ;;  %v387_v30 = vld [vmem:[#allocation4] sm:$0xff]  ;;  %v373_v3 = vld [vmem:[#allocation2 + $0x8] sm:$0xff] }
  0x3d   : > { %323 = vmatpush.msra.mxu2 %v240_v22  ;;  %343 = vmatpush.msra.mxu3 %v241_v23 }
  0x3e   : > { %527 = vmatmul.msk.f32.vlgmr.msra.gmra.mxu2 %vm304_vm0, %v303_v25  ;;  %528 = vmatmul.msk.f32.vlgmr.msra.gmra.mxu3 %vm304_vm0, %v303_v25 }
  0x3f   : > { %523 = vmatmul.msk.f32.vlgmr.msra.gmra.mxu0 %vm253_vm1, %v252_v26  ;;  %524 = vmatmul.msk.f32.vlgmr.msra.gmra.mxu1 %vm253_vm1, %v252_v26 }
  0xbc   : > { %v274_v27 = vpop.f32.mrf.mxu0  ;;  %v294_v29 = vpop.f32.mrf.mxu1 }
  0xbd   : > { %vm297_vm2 = vcmp.gt.f32.partialorder %v274_v27, 0.0  ;;  %vm298_vm3 = vcmp.gt.f32.partialorder %v294_v29, 0.0 }
  0xbe   : > { %v525_v32 = vsel %vm297_vm2, 1.0, %v664_v31  ;;  %v526_v33 = vsel %vm298_vm3, 1.0, %v664_v31 }
  0xbf   : > { %v388_v34 = vadd.f32 %v525_v32, %v386_v28  ;;  %v389_v35 = vadd.f32 %v526_v33, %v387_v30 }
  0xc1   : > { %390 = vst [vmem:[#allocation4 + $0x8] sm:$0xff] %v388_v34  ;;  %v325_v36 = vpop.f32.mrf.mxu2  ;;  %v345_v37 = vpop.f32.mrf.mxu3 }
  0xc2   : > { %391 = vst [vmem:[#allocation4] sm:$0xff] %v389_v35  ;;  %v348_v38 = vmul.f32 0.1, %v325_v36  ;;  %v349_v39 = vmul.f32 0.1, %v345_v37 }
  0xc4   : > { %v350_v40 = vand.u32 2147483647, %v348_v38  ;;  %v351_v41 = vand.u32 2147483647, %v349_v39  ;;  %v364_v53 = vmax.f32 %v348_v38, 0.0  ;;  %v365_v55 = vmax.f32 %v349_v39, 0.0 }
  0xc5   : > { %v368_v57 = vmul.f32 %v525_v32, %v348_v38  ;;  %v369_v60 = vmul.f32 %v526_v33, %v349_v39 }
  0xc6   : > { %v352_v42 = vsub.f32 0.0, %v350_v40  ;;  %v353_v43 = vsub.f32 0.0, %v351_v41 }
  0xc8   : > { %v354_v44 = vmul.f32 1.442695, %v352_v42  ;;  %v356_v45 = vmul.f32 1.442695, %v353_v43 }
  0xca   : > { %599 = vpow2.f32 %v354_v44 }
  0xcb   : > { %601 = vpow2.f32 %v356_v45 }
  0xd0   : > { %v600_v46 = vpop.eup %599 }
  0xd1   : > { %v602_v47 = vpop.eup %601  ;;  %v358_v48 = vadd.f32 1.0, %v600_v46 }
  0xd2   : > { %v359_v49 = vadd.f32 1.0, %v602_v47 }
  0xd3   : > { %603 = vlog2.f32 %v358_v48 }
  0xd4   : > { %605 = vlog2.f32 %v359_v49 }
  0xd9   : > { %v604_v50 = vpop.eup %603 }
  0xda   : > { %v606_v51 = vpop.eup %605  ;;  %v361_v52 = vmul.f32 0.6931472, %v604_v50 }
  0xdb   : > { %v363_v54 = vmul.f32 0.6931472, %v606_v51 }
  0xdc   : > { %v366_v56 = vadd.f32 %v364_v53, %v361_v52 }
  0xdd   : > { %v367_v59 = vadd.f32 %v365_v55, %v363_v54 }
  0xde   : > { %v370_v61 = vsub.f32 %v366_v56, %v368_v57 }
  0xdf   : > { %v371_v0 = vsub.f32 %v367_v59, %v369_v60 }
  0xe0   : > { %v374_v1 = vmul.f32 %v525_v32, %v370_v61  ;;  %v382_v2 = vadd.f32 %v380_v58, %v370_v61 }
  0xe1   : > { %v375_v4 = vmul.f32 %v526_v33, %v371_v0  ;;  %v383_v5 = vadd.f32 %v381_v62, %v371_v0  ;;  %395 = sbr.rel (%p529_p12) target bundleno = 432 (0x1b0), region = 63 }
  0xe2   : > { %v376_v6 = vadd.f32 %v374_v1, %v372_v63  ;;  %384 = vst [vmem:[#allocation3 + $0x8] sm:$0xff] %v382_v2 }
  0xe3   : > { %v377_v7 = vadd.f32 %v375_v4, %v373_v3  ;;  %385 = vst [vmem:[#allocation3] sm:$0xff] %v383_v5 }
  0xe4   : > { %378 = vst [vmem:[#allocation2] sm:$0xff] %v376_v6 }
  0xe5   : > { %379 = vst [vmem:[#allocation2 + $0x8] sm:$0xff] %v377_v7 }
  0xe6   : > { %v420_v10 = vld [vmem:[#allocation4 + $0x8] sm:$0xff]  ;;  %v421_v12 = vld [vmem:[#allocation4] sm:$0xff]  ;;  %v432_v38 = vlaneseq }
  0xe7   : > { %v422_v13 = vadd.f32 %v421_v12, %v420_v10 }
  0xe8   : > { %v433_v39 = vand.u32 127, %v432_v38 }
  0xe9   : > { %423 = vadd.xlane.f32.xlu1 %v422_v13  ;;  %v408_v14 = vld [vmem:[#allocation3 + $0x8] sm:$0xff] }
  0xea   : > { %v409_v15 = vld [vmem:[#allocation3] sm:$0xff]  ;;  %vm434_vm4 = vcmp.eq.s32.totalorder %v433_v39, 0  ;;  %vm437_vm5 = vcmp.eq.s32.totalorder %v433_v39, 1  ;;  %vm441_vm6 = vcmp.eq.s32.totalorder %v433_v39, 2 }
  0xeb   : > { %v396_v8 = vld [vmem:[#allocation2] sm:$0xff]  ;;  %v410_v16 = vadd.f32 %v409_v15, %v408_v14 }
  0xec   : > { %v397_v9 = vld [vmem:[#allocation2 + $0x8] sm:$0xff] }
  0xed   : > { %v398_v11 = vadd.f32 %v397_v9, %v396_v8 }
  0xef   : > { %399 = vadd.xlane.f32.xlu0 %v398_v11 }
  0xf7   : > { %411 = vadd.xlane.f32.xlu0 %v410_v16 }
 0x15c   : > { %v424_v19 = vpop.xlane.xlu1 %423 }
 0x15d   : > { %v425_v20 = vrot.slane %v424_v19, 4 }
 0x15f   : > { %v426_v22 = vadd.f32 %v425_v20, %v424_v19 }
 0x161   : > { %v427_v25 = vrot.slane %v426_v22, 2 }
 0x162   : > { %v400_v17 = vpop.xlane.xlu0 %399 }
 0x163   : > { %v401_v18 = vrot.slane %v400_v17, 4  ;;  %v428_v31 = vadd.f32 %v427_v25, %v426_v22 }
 0x165   : > { %v402_v21 = vadd.f32 %v401_v18, %v400_v17  ;;  %v429_v34 = vrot.slane %v428_v31, 1 }
 0x167   : > { %v403_v23 = vrot.slane %v402_v21, 2  ;;  %v430_v37 = vadd.f32 %v429_v34, %v428_v31 }
 0x169   : > { %v404_v24 = vadd.f32 %v403_v23, %v402_v21 }
 0x16a   : > { %v412_v26 = vpop.xlane.xlu0 %411 }
 0x16b   : > { %v413_v27 = vrot.slane %v412_v26, 4  ;;  %v405_v28 = vrot.slane %v404_v24, 1 }
 0x16d   : > { %v414_v29 = vadd.f32 %v413_v27, %v412_v26  ;;  %v406_v30 = vadd.f32 %v405_v28, %v404_v24 }
 0x16f   : > { %v415_v32 = vrot.slane %v414_v29, 2  ;;  %535 = vpush %v406_v30 }
 0x171   : > { %v416_v33 = vadd.f32 %v415_v32, %v414_v29 }
 0x173   : > { %v417_v35 = vrot.slane %v416_v33, 1 }
 0x175   : > { %v418_v36 = vadd.f32 %v417_v35, %v416_v33 }
 0x177   : > { %537 = vpush %v418_v36 }
 0x178   : > { %539 = vpush %v430_v37 }
 0x1a0   : > { %s536_s14 = spop %535 }
 0x1a1   : > { %v435_v40 = vstv %s536_s14 }
 0x1a2   : > { %v436_v42 = vsel %vm434_vm4, %v435_v40, 0.0 }
 0x1a8   : > { %s538_s26 = spop %537 }
 0x1a9   : > { %v438_v41 = vstv %s538_s26  ;;  %s540_s28 = spop %539 }
 0x1aa   : > { %v439_v43 = vsel %vm437_vm5, %v438_v41, 0.0  ;;  %v442_v44 = vstv %s540_s28 }
 0x1ab   : > { %v440_v45 = vadd.f32 %v439_v43, %v436_v42  ;;  %v443_v46 = vsel %vm441_vm6, %v442_v44, 0.0 }
 0x1ad   : > { %v444_v47 = vadd.f32 %v443_v46, %v440_v45 }
 0x1af   : > { %445 = vst [vmem:[%s229_s21] sm:$0x1] %v444_v47 }
 0x1b0 PF: > { %s13_s18 = sadd.s32 1, %s661_s18   ;;  %s792_s12 = smov %s641_s13 }
 0x1b1   : > { %p10_p13 = scmp.ge.s32.totalorder %s13_s18, 10   ;;  %s793_s13 = smov %s736_s27 }
 0x1b2   : > { %s794_s14 = smov %s653_s16  ;;  %s795_s15 = smov %s657_s17 }
 0x1b3   : > { %s796_s16 = smov %s799_s19  ;;  %s797_s17 = smov %s803_s20 }
 0x1b4   :  { %12 = sbr.rel (!%p10_p13) target bundleno = 4 (0x4), region = 98 }

</bundles_post_ra>
